<compile_context>
chip_gen: v7x
topology: tpu7x:2x2x1
jax: 0.10.0
libtpu: 0.0.40
codegen_flags: <defaults>
</compile_context>

<pallas_src>
import jax
import jax.numpy as jnp
import numpy as np
from jax import lax
from jax.experimental import pallas as pl
from jax.experimental.pallas import tpu as pltpu


def lstm_kernel(x_ref, wih_ref, whh_ref, b_ref, wfc_ref, bfc_ref,
                out_ref, gx_scr):
    T, BB, I = x_ref.shape
    H = whh_ref.shape[0]

    # ---- Phase 1: hoisted input projection — one MXU matmul for all timesteps.
    x_flat = x_ref[...].reshape(T * BB, I)                      # bf16, (T*BB, I)
    gx = jnp.dot(x_flat, wih_ref[...],
                 preferred_element_type=jnp.float32) + b_ref[...]
    gx_scr[...] = gx.reshape(T, BB, 4 * H)                      # f32 scratch

    # Lane mask selecting the 'g' gate range (tanh); i/f/o get sigmoid.
    # Hoisted out of the loop (broadcasts are not CSE'd).
    lane = lax.broadcasted_iota(jnp.int32, (BB, 4 * H), 1)
    g_mask = (lane >= 2 * H) & (lane < 3 * H)

    # ---- Phase 2: sequential recurrence, fully unrolled in-kernel loop.
    def step(t, carry):
        h, c = carry
        gates = gx_scr[t] + jnp.dot(h.astype(jnp.bfloat16), whh_ref[...],
                                    preferred_element_type=jnp.float32)
        act = jnp.where(g_mask, jnp.tanh(gates), jax.nn.sigmoid(gates))
        i_g = act[:, 0 * H:1 * H]
        f_g = act[:, 1 * H:2 * H]
        g_g = act[:, 2 * H:3 * H]
        o_g = act[:, 3 * H:4 * H]
        c_new = f_g * c + i_g * g_g
        h_new = o_g * jnp.tanh(c_new)
        return h_new, c_new

    h0 = jnp.zeros((BB, H), jnp.float32)
    c0 = jnp.zeros((BB, H), jnp.float32)
    h_last, _ = lax.fori_loop(0, T, step, (h0, c0), unroll=True)

    # ---- Final Linear on the last hidden state (output padded to 128 lanes).
    out_ref[...] = (jnp.dot(h_last.astype(jnp.bfloat16), wfc_ref[...],
                            preferred_element_type=jnp.float32)
                    + bfc_ref[...]).astype(out_ref.dtype)


def lstm_forward(x_bti, w_ih, w_hh, b_ih, b_hh, w_fc, b_fc):
    """x_bti: (B, T, I) float32.  PyTorch-shaped params:
       w_ih (4H, I), w_hh (4H, H), b_ih (4H,), b_hh (4H,), w_fc (O, H), b_fc (O,)."""
    B, T, I = x_bti.shape
    H = w_hh.shape[1]
    O = w_fc.shape[0]
    O_pad = max(128, ((O + 127) // 128) * 128)      # lane-dense output store

    # NOTE: at production sizes the producer should emit time-major x directly
    # (this transpose is an extra HBM pass); negligible at these shapes.
    x_tbi = jnp.transpose(x_bti, (1, 0, 2)).astype(jnp.bfloat16)   # (T, B, I)
    wih_t = jnp.transpose(w_ih).astype(jnp.bfloat16)               # (I, 4H)
    whh_t = jnp.transpose(w_hh).astype(jnp.bfloat16)               # (H, 4H)
    b = (b_ih + b_hh).reshape(1, 4 * H).astype(jnp.float32)        # (1, 4H)
    wfc_pad = jnp.zeros((H, O_pad), jnp.bfloat16).at[:, :O].set(
        jnp.transpose(w_fc).astype(jnp.bfloat16))                  # (H, O_pad)
    bfc_pad = jnp.zeros((1, O_pad), jnp.float32).at[:, :O].set(
        b_fc.reshape(1, O).astype(jnp.float32))                    # (1, O_pad)

    # Batch blocking: the only grid axis is "parallel" over batch shards, so
    # large B can split across v7x's two TensorCores; time stays in-kernel.
    bb = B if (B <= 8 or B % 16 != 0) else B // 2
    grid = (B // bb,)

    const = lambda i: (0, 0)
    grid_spec = pltpu.PrefetchScalarGridSpec(
        num_scalar_prefetch=0,
        grid=grid,
        in_specs=[
            pl.BlockSpec((T, bb, I), lambda i: (0, i, 0)),   # x (time-major), bf16
            pl.BlockSpec((I, 4 * H), const),                 # W_ih^T (resident)
            pl.BlockSpec((H, 4 * H), const),                 # W_hh^T (resident)
            pl.BlockSpec((1, 4 * H), const),                 # b_ih + b_hh
            pl.BlockSpec((H, O_pad), const),                 # W_fc^T (lane-padded)
            pl.BlockSpec((1, O_pad), const),                 # b_fc  (lane-padded)
        ],
        out_specs=pl.BlockSpec((bb, O_pad), lambda i: (i, 0)),
        scratch_shapes=[
            pltpu.VMEM((T, bb, 4 * H), jnp.float32),         # hoisted x-gates
        ],
    )

    # TODO(synk): at large H (e.g. 2048), single-buffer the resident weight
    # BlockSpecs and set vmem_limit_bytes explicitly to fit v7x's 64 MiB VMEM.
    out_pad = pl.pallas_call(
        lstm_kernel,
        out_shape=jax.ShapeDtypeStruct((B, O_pad), jnp.float32),
        grid_spec=grid_spec,
        compiler_params=pltpu.CompilerParams(
            dimension_semantics=("parallel",)),
    )(x_tbi, wih_t, whh_t, b, wfc_pad, bfc_pad)

    return out_pad[:, :O]


def lstm_reference(x_bti, w_ih, w_hh, b_ih, b_hh, w_fc, b_fc):
    """Pure-JAX f32 reference matching PyTorch nn.LSTM + Linear semantics."""
    B, T, I = x_bti.shape
    H = w_hh.shape[1]

    def step(carry, x_t):
        h, c = carry
        gates = x_t @ w_ih.T + b_ih + h @ w_hh.T + b_hh
        i_g = jax.nn.sigmoid(gates[:, 0 * H:1 * H])
        f_g = jax.nn.sigmoid(gates[:, 1 * H:2 * H])
        g_g = jnp.tanh(gates[:, 2 * H:3 * H])
        o_g = jax.nn.sigmoid(gates[:, 3 * H:4 * H])
        c_new = f_g * c + i_g * g_g
        h_new = o_g * jnp.tanh(c_new)
        return (h_new, c_new), h_new

    h0 = jnp.zeros((B, H), jnp.float32)
    c0 = jnp.zeros((B, H), jnp.float32)
    (h_last, _), _ = jax.lax.scan(step, (h0, c0), jnp.transpose(x_bti, (1, 0, 2)))
    return h_last @ w_fc.T + b_fc


if __name__ == "__main__":
    B, T, I, H, O = 8, 8, 16, 32, 8

    key = jax.random.PRNGKey(0)
    ks = jax.random.split(key, 7)
    bound = 1.0 / np.sqrt(H)  # PyTorch default LSTM/Linear init range
    w_ih = jax.random.uniform(ks[0], (4 * H, I), jnp.float32, -bound, bound)
    w_hh = jax.random.uniform(ks[1], (4 * H, H), jnp.float32, -bound, bound)
    b_ih = jax.random.uniform(ks[2], (4 * H,), jnp.float32, -bound, bound)
    b_hh = jax.random.uniform(ks[3], (4 * H,), jnp.float32, -bound, bound)
    w_fc = jax.random.uniform(ks[4], (O, H), jnp.float32, -bound, bound)
    b_fc = jax.random.uniform(ks[5], (O,), jnp.float32, -bound, bound)
    x = jax.random.normal(ks[6], (B, T, I), jnp.float32)

    out = jax.block_until_ready(lstm_forward(x, w_ih, w_hh, b_ih, b_hh, w_fc, b_fc))
    ref = jax.block_until_ready(lstm_reference(x, w_ih, w_hh, b_ih, b_hh, w_fc, b_fc))

    assert out.shape == (B, O)
    # bf16 matmul operands (f32 accumulation) introduce ~1e-2-level differences
    # vs. the pure-f32 reference; tolerance chosen accordingly.
    np.testing.assert_allclose(np.asarray(out), np.asarray(ref), rtol=4e-2, atol=4e-2)

    print("KERNEL_OK")
</pallas_src>

<mosaic_0001>
module attributes {stable_mosaic.version = 11 : i64} {
  func.func @lstm_kernel(%arg0: i32, %arg1: memref<8x8x16xbf16, #tpu.memory_space<vmem>>, %arg2: memref<16x128xbf16, #tpu.memory_space<vmem>>, %arg3: memref<32x128xbf16, #tpu.memory_space<vmem>>, %arg4: memref<1x128xf32, #tpu.memory_space<vmem>>, %arg5: memref<32x128xbf16, #tpu.memory_space<vmem>>, %arg6: memref<1x128xf32, #tpu.memory_space<vmem>>, %arg7: memref<8x128xf32, #tpu.memory_space<vmem>>, %arg8: memref<8x8x128xf32, #tpu.memory_space<vmem>>) attributes {dimension_semantics = [#tpu.dimension_semantics<parallel>], iteration_bounds = array<i64: 1>, scalar_prefetch = 0 : i64, scratch_operands = 1 : i64, tpu.core_type = #tpu.core_type<tc>, window_params = [{transform_indices = @transform_0, window_bounds = array<i64: 8, 8, 16>}, {pipeline_mode = #tpu.pipeline_mode<synchronous>, transform_indices = @transform_1, window_bounds = array<i64: 16, 128>}, {pipeline_mode = #tpu.pipeline_mode<synchronous>, transform_indices = @transform_2, window_bounds = array<i64: 32, 128>}, {pipeline_mode = #tpu.pipeline_mode<synchronous>, transform_indices = @transform_3, window_bounds = array<i64: 1, 128>}, {pipeline_mode = #tpu.pipeline_mode<synchronous>, transform_indices = @transform_4, window_bounds = array<i64: 32, 128>}, {pipeline_mode = #tpu.pipeline_mode<synchronous>, transform_indices = @transform_5, window_bounds = array<i64: 1, 128>}, {transform_indices = @transform_6, window_bounds = array<i64: 8, 128>}]} {
    %c0 = arith.constant 0 : index
    %c0_0 = arith.constant 0 : index
    %c0_1 = arith.constant 0 : index
    %0 = vector.load %arg1[%c0, %c0_0, %c0_1] : memref<8x8x16xbf16, #tpu.memory_space<vmem>>, vector<8x8x16xbf16>
    %1 = vector.shape_cast %0 : vector<8x8x16xbf16> to vector<64x16xbf16>
    %c0_2 = arith.constant 0 : index
    %c0_3 = arith.constant 0 : index
    %2 = vector.load %arg2[%c0_2, %c0_3] : memref<16x128xbf16, #tpu.memory_space<vmem>>, vector<16x128xbf16>
    %cst = arith.constant dense<0.000000e+00> : vector<64x128xf32>
    %3 = tpu.matmul %1, %2, %cst {dimension_numbers = #tpu.dot_dimension_numbers<[1], [0], [0], [1], [0, 0, 1, 1], [], []>} : vector<64x16xbf16>, vector<16x128xbf16>, vector<64x128xf32> -> vector<64x128xf32>
    %c0_4 = arith.constant 0 : index
    %c0_5 = arith.constant 0 : index
    %4 = vector.load %arg4[%c0_4, %c0_5] : memref<1x128xf32, #tpu.memory_space<vmem>>, vector<1x128xf32>
    %5 = vector.broadcast %4 : vector<1x128xf32> to vector<64x128xf32>
    %6 = arith.addf %3, %5 : vector<64x128xf32>
    %7 = vector.shape_cast %6 : vector<64x128xf32> to vector<8x8x128xf32>
    %c0_6 = arith.constant 0 : index
    %c0_7 = arith.constant 0 : index
    %c0_8 = arith.constant 0 : index
    %8 = vector.load %arg8[%c0_6, %c0_7, %c0_8] : memref<8x8x128xf32, #tpu.memory_space<vmem>>, vector<8x8x128xf32>
    tpu.vector_store %arg8[%c0_6, %c0_7, %c0_8], %7 {strides = array<i32>} : memref<8x8x128xf32, #tpu.memory_space<vmem>>, vector<8x8x128xf32>,
    %9 = tpu.iota {dimensions = array<i32: 1>} : vector<8x128xi32>
    %c64_i32 = arith.constant 64 : i32
    %10 = vector.broadcast %c64_i32 : i32 to vector<8x128xi32>
    %11 = arith.cmpi sge, %9, %10 : vector<8x128xi32>
    %c96_i32 = arith.constant 96 : i32
    %12 = vector.broadcast %c96_i32 : i32 to vector<8x128xi32>
    %13 = arith.cmpi slt, %9, %12 : vector<8x128xi32>
    %14 = arith.andi %11, %13 : vector<8x128xi1>
    %cst_9 = arith.constant 0.000000e+00 : f32
    %15 = vector.broadcast %cst_9 : f32 to vector<8x32xf32>
    %cst_10 = arith.constant 0.000000e+00 : f32
    %16 = vector.broadcast %cst_10 : f32 to vector<8x32xf32>
    %c0_i32 = arith.constant 0 : i32
    %17 = arith.index_cast %c0_i32 : i32 to index
    %c0_11 = arith.constant 0 : index
    %c0_12 = arith.constant 0 : index
    %18 = vector.load %arg8[%17, %c0_11, %c0_12] : memref<8x8x128xf32, #tpu.memory_space<vmem>>, vector<1x8x128xf32>
    %19 = vector.shape_cast %18 : vector<1x8x128xf32> to vector<8x128xf32>
    %20 = arith.truncf %15 : vector<8x32xf32> to vector<8x32xbf16>
    %c0_13 = arith.constant 0 : index
    %c0_14 = arith.constant 0 : index
    %21 = vector.load %arg3[%c0_13, %c0_14] : memref<32x128xbf16, #tpu.memory_space<vmem>>, vector<32x128xbf16>
    %cst_15 = arith.constant dense<0.000000e+00> : vector<8x128xf32>
    %22 = tpu.matmul %20, %21, %cst_15 {dimension_numbers = #tpu.dot_dimension_numbers<[1], [0], [0], [1], [0, 0, 1, 1], [], []>} : vector<8x32xbf16>, vector<32x128xbf16>, vector<8x128xf32> -> vector<8x128xf32>
    %23 = arith.addf %19, %22 : vector<8x128xf32>
    %24 = math.tanh %23 : vector<8x128xf32>
    %25 = arith.negf %23 : vector<8x128xf32>
    %26 = math.exp %25 : vector<8x128xf32>
    %cst_16 = arith.constant 1.000000e+00 : f32
    %27 = vector.broadcast %cst_16 : f32 to vector<8x128xf32>
    %28 = arith.addf %27, %26 : vector<8x128xf32>
    %29 = arith.divf %27, %28 : vector<8x128xf32>
    %30 = arith.select %14, %24, %29 : vector<8x128xi1>, vector<8x128xf32>
    %31 = vector.extract_strided_slice %30 {offsets = [0, 0], sizes = [8, 32], strides = [1, 1]} : vector<8x128xf32> to vector<8x32xf32>
    %32 = vector.extract_strided_slice %30 {offsets = [0, 32], sizes = [8, 32], strides = [1, 1]} : vector<8x128xf32> to vector<8x32xf32>
    %33 = vector.extract_strided_slice %30 {offsets = [0, 64], sizes = [8, 32], strides = [1, 1]} : vector<8x128xf32> to vector<8x32xf32>
    %34 = vector.extract_strided_slice %30 {offsets = [0, 96], sizes = [8, 32], strides = [1, 1]} : vector<8x128xf32> to vector<8x32xf32>
    %35 = arith.mulf %32, %16 : vector<8x32xf32>
    %36 = arith.mulf %31, %33 : vector<8x32xf32>
    %37 = arith.addf %35, %36 : vector<8x32xf32>
    %38 = math.tanh %37 : vector<8x32xf32>
    %39 = arith.mulf %34, %38 : vector<8x32xf32>
    %c1_i32 = arith.constant 1 : i32
    %40 = arith.index_cast %c1_i32 : i32 to index
    %c0_17 = arith.constant 0 : index
    %c0_18 = arith.constant 0 : index
    %41 = vector.load %arg8[%40, %c0_17, %c0_18] : memref<8x8x128xf32, #tpu.memory_space<vmem>>, vector<1x8x128xf32>
    %42 = vector.shape_cast %41 : vector<1x8x128xf32> to vector<8x128xf32>
    %43 = arith.truncf %39 : vector<8x32xf32> to vector<8x32xbf16>
    %c0_19 = arith.constant 0 : index
    %c0_20 = arith.constant 0 : index
    %44 = vector.load %arg3[%c0_19, %c0_20] : memref<32x128xbf16, #tpu.memory_space<vmem>>, vector<32x128xbf16>
    %cst_21 = arith.constant dense<0.000000e+00> : vector<8x128xf32>
    %45 = tpu.matmul %43, %44, %cst_21 {dimension_numbers = #tpu.dot_dimension_numbers<[1], [0], [0], [1], [0, 0, 1, 1], [], []>} : vector<8x32xbf16>, vector<32x128xbf16>, vector<8x128xf32> -> vector<8x128xf32>
    %46 = arith.addf %42, %45 : vector<8x128xf32>
    %47 = math.tanh %46 : vector<8x128xf32>
    %48 = arith.negf %46 : vector<8x128xf32>
    %49 = math.exp %48 : vector<8x128xf32>
    %cst_22 = arith.constant 1.000000e+00 : f32
    %50 = vector.broadcast %cst_22 : f32 to vector<8x128xf32>
    %51 = arith.addf %50, %49 : vector<8x128xf32>
    %52 = arith.divf %50, %51 : vector<8x128xf32>
    %53 = arith.select %14, %47, %52 : vector<8x128xi1>, vector<8x128xf32>
    %54 = vector.extract_strided_slice %53 {offsets = [0, 0], sizes = [8, 32], strides = [1, 1]} : vector<8x128xf32> to vector<8x32xf32>
    %55 = vector.extract_strided_slice %53 {offsets = [0, 32], sizes = [8, 32], strides = [1, 1]} : vector<8x128xf32> to vector<8x32xf32>
    %56 = vector.extract_strided_slice %53 {offsets = [0, 64], sizes = [8, 32], strides = [1, 1]} : vector<8x128xf32> to vector<8x32xf32>
    %57 = vector.extract_strided_slice %53 {offsets = [0, 96], sizes = [8, 32], strides = [1, 1]} : vector<8x128xf32> to vector<8x32xf32>
    %58 = arith.mulf %55, %37 : vector<8x32xf32>
    %59 = arith.mulf %54, %56 : vector<8x32xf32>
    %60 = arith.addf %58, %59 : vector<8x32xf32>
    %61 = math.tanh %60 : vector<8x32xf32>
    %62 = arith.mulf %57, %61 : vector<8x32xf32>
    %c2_i32 = arith.constant 2 : i32
    %63 = arith.index_cast %c2_i32 : i32 to index
    %c0_23 = arith.constant 0 : index
    %c0_24 = arith.constant 0 : index
    %64 = vector.load %arg8[%63, %c0_23, %c0_24] : memref<8x8x128xf32, #tpu.memory_space<vmem>>, vector<1x8x128xf32>
    %65 = vector.shape_cast %64 : vector<1x8x128xf32> to vector<8x128xf32>
    %66 = arith.truncf %62 : vector<8x32xf32> to vector<8x32xbf16>
    %c0_25 = arith.constant 0 : index
    %c0_26 = arith.constant 0 : index
    %67 = vector.load %arg3[%c0_25, %c0_26] : memref<32x128xbf16, #tpu.memory_space<vmem>>, vector<32x128xbf16>
    %cst_27 = arith.constant dense<0.000000e+00> : vector<8x128xf32>
    %68 = tpu.matmul %66, %67, %cst_27 {dimension_numbers = #tpu.dot_dimension_numbers<[1], [0], [0], [1], [0, 0, 1, 1], [], []>} : vector<8x32xbf16>, vector<32x128xbf16>, vector<8x128xf32> -> vector<8x128xf32>
    %69 = arith.addf %65, %68 : vector<8x128xf32>
    %70 = math.tanh %69 : vector<8x128xf32>
    %71 = arith.negf %69 : vector<8x128xf32>
    %72 = math.exp %71 : vector<8x128xf32>
    %cst_28 = arith.constant 1.000000e+00 : f32
    %73 = vector.broadcast %cst_28 : f32 to vector<8x128xf32>
    %74 = arith.addf %73, %72 : vector<8x128xf32>
    %75 = arith.divf %73, %74 : vector<8x128xf32>
    %76 = arith.select %14, %70, %75 : vector<8x128xi1>, vector<8x128xf32>
    %77 = vector.extract_strided_slice %76 {offsets = [0, 0], sizes = [8, 32], strides = [1, 1]} : vector<8x128xf32> to vector<8x32xf32>
    %78 = vector.extract_strided_slice %76 {offsets = [0, 32], sizes = [8, 32], strides = [1, 1]} : vector<8x128xf32> to vector<8x32xf32>
    %79 = vector.extract_strided_slice %76 {offsets = [0, 64], sizes = [8, 32], strides = [1, 1]} : vector<8x128xf32> to vector<8x32xf32>
    %80 = vector.extract_strided_slice %76 {offsets = [0, 96], sizes = [8, 32], strides = [1, 1]} : vector<8x128xf32> to vector<8x32xf32>
    %81 = arith.mulf %78, %60 : vector<8x32xf32>
    %82 = arith.mulf %77, %79 : vector<8x32xf32>
    %83 = arith.addf %81, %82 : vector<8x32xf32>
    %84 = math.tanh %83 : vector<8x32xf32>
    %85 = arith.mulf %80, %84 : vector<8x32xf32>
    %c3_i32 = arith.constant 3 : i32
    %86 = arith.index_cast %c3_i32 : i32 to index
    %c0_29 = arith.constant 0 : index
    %c0_30 = arith.constant 0 : index
    %87 = vector.load %arg8[%86, %c0_29, %c0_30] : memref<8x8x128xf32, #tpu.memory_space<vmem>>, vector<1x8x128xf32>
    %88 = vector.shape_cast %87 : vector<1x8x128xf32> to vector<8x128xf32>
    %89 = arith.truncf %85 : vector<8x32xf32> to vector<8x32xbf16>
    %c0_31 = arith.constant 0 : index
    %c0_32 = arith.constant 0 : index
    %90 = vector.load %arg3[%c0_31, %c0_32] : memref<32x128xbf16, #tpu.memory_space<vmem>>, vector<32x128xbf16>
    %cst_33 = arith.constant dense<0.000000e+00> : vector<8x128xf32>
    %91 = tpu.matmul %89, %90, %cst_33 {dimension_numbers = #tpu.dot_dimension_numbers<[1], [0], [0], [1], [0, 0, 1, 1], [], []>} : vector<8x32xbf16>, vector<32x128xbf16>, vector<8x128xf32> -> vector<8x128xf32>
    %92 = arith.addf %88, %91 : vector<8x128xf32>
    %93 = math.tanh %92 : vector<8x128xf32>
    %94 = arith.negf %92 : vector<8x128xf32>
    %95 = math.exp %94 : vector<8x128xf32>
    %cst_34 = arith.constant 1.000000e+00 : f32
    %96 = vector.broadcast %cst_34 : f32 to vector<8x128xf32>
    %97 = arith.addf %96, %95 : vector<8x128xf32>
    %98 = arith.divf %96, %97 : vector<8x128xf32>
    %99 = arith.select %14, %93, %98 : vector<8x128xi1>, vector<8x128xf32>
    %100 = vector.extract_strided_slice %99 {offsets = [0, 0], sizes = [8, 32], strides = [1, 1]} : vector<8x128xf32> to vector<8x32xf32>
    %101 = vector.extract_strided_slice %99 {offsets = [0, 32], sizes = [8, 32], strides = [1, 1]} : vector<8x128xf32> to vector<8x32xf32>
    %102 = vector.extract_strided_slice %99 {offsets = [0, 64], sizes = [8, 32], strides = [1, 1]} : vector<8x128xf32> to vector<8x32xf32>
    %103 = vector.extract_strided_slice %99 {offsets = [0, 96], sizes = [8, 32], strides = [1, 1]} : vector<8x128xf32> to vector<8x32xf32>
    %104 = arith.mulf %101, %83 : vector<8x32xf32>
    %105 = arith.mulf %100, %102 : vector<8x32xf32>
    %106 = arith.addf %104, %105 : vector<8x32xf32>
    %107 = math.tanh %106 : vector<8x32xf32>
    %108 = arith.mulf %103, %107 : vector<8x32xf32>
    %c4_i32 = arith.constant 4 : i32
    %109 = arith.index_cast %c4_i32 : i32 to index
    %c0_35 = arith.constant 0 : index
    %c0_36 = arith.constant 0 : index
    %110 = vector.load %arg8[%109, %c0_35, %c0_36] : memref<8x8x128xf32, #tpu.memory_space<vmem>>, vector<1x8x128xf32>
    %111 = vector.shape_cast %110 : vector<1x8x128xf32> to vector<8x128xf32>
    %112 = arith.truncf %108 : vector<8x32xf32> to vector<8x32xbf16>
    %c0_37 = arith.constant 0 : index
    %c0_38 = arith.constant 0 : index
    %113 = vector.load %arg3[%c0_37, %c0_38] : memref<32x128xbf16, #tpu.memory_space<vmem>>, vector<32x128xbf16>
    %cst_39 = arith.constant dense<0.000000e+00> : vector<8x128xf32>
    %114 = tpu.matmul %112, %113, %cst_39 {dimension_numbers = #tpu.dot_dimension_numbers<[1], [0], [0], [1], [0, 0, 1, 1], [], []>} : vector<8x32xbf16>, vector<32x128xbf16>, vector<8x128xf32> -> vector<8x128xf32>
    %115 = arith.addf %111, %114 : vector<8x128xf32>
    %116 = math.tanh %115 : vector<8x128xf32>
    %117 = arith.negf %115 : vector<8x128xf32>
    %118 = math.exp %117 : vector<8x128xf32>
    %cst_40 = arith.constant 1.000000e+00 : f32
    %119 = vector.broadcast %cst_40 : f32 to vector<8x128xf32>
    %120 = arith.addf %119, %118 : vector<8x128xf32>
    %121 = arith.divf %119, %120 : vector<8x128xf32>
    %122 = arith.select %14, %116, %121 : vector<8x128xi1>, vector<8x128xf32>
    %123 = vector.extract_strided_slice %122 {offsets = [0, 0], sizes = [8, 32], strides = [1, 1]} : vector<8x128xf32> to vector<8x32xf32>
    %124 = vector.extract_strided_slice %122 {offsets = [0, 32], sizes = [8, 32], strides = [1, 1]} : vector<8x128xf32> to vector<8x32xf32>
    %125 = vector.extract_strided_slice %122 {offsets = [0, 64], sizes = [8, 32], strides = [1, 1]} : vector<8x128xf32> to vector<8x32xf32>
    %126 = vector.extract_strided_slice %122 {offsets = [0, 96], sizes = [8, 32], strides = [1, 1]} : vector<8x128xf32> to vector<8x32xf32>
    %127 = arith.mulf %124, %106 : vector<8x32xf32>
    %128 = arith.mulf %123, %125 : vector<8x32xf32>
    %129 = arith.addf %127, %128 : vector<8x32xf32>
    %130 = math.tanh %129 : vector<8x32xf32>
    %131 = arith.mulf %126, %130 : vector<8x32xf32>
    %c5_i32 = arith.constant 5 : i32
    %132 = arith.index_cast %c5_i32 : i32 to index
    %c0_41 = arith.constant 0 : index
    %c0_42 = arith.constant 0 : index
    %133 = vector.load %arg8[%132, %c0_41, %c0_42] : memref<8x8x128xf32, #tpu.memory_space<vmem>>, vector<1x8x128xf32>
    %134 = vector.shape_cast %133 : vector<1x8x128xf32> to vector<8x128xf32>
    %135 = arith.truncf %131 : vector<8x32xf32> to vector<8x32xbf16>
    %c0_43 = arith.constant 0 : index
    %c0_44 = arith.constant 0 : index
    %136 = vector.load %arg3[%c0_43, %c0_44] : memref<32x128xbf16, #tpu.memory_space<vmem>>, vector<32x128xbf16>
    %cst_45 = arith.constant dense<0.000000e+00> : vector<8x128xf32>
    %137 = tpu.matmul %135, %136, %cst_45 {dimension_numbers = #tpu.dot_dimension_numbers<[1], [0], [0], [1], [0, 0, 1, 1], [], []>} : vector<8x32xbf16>, vector<32x128xbf16>, vector<8x128xf32> -> vector<8x128xf32>
    %138 = arith.addf %134, %137 : vector<8x128xf32>
    %139 = math.tanh %138 : vector<8x128xf32>
    %140 = arith.negf %138 : vector<8x128xf32>
    %141 = math.exp %140 : vector<8x128xf32>
    %cst_46 = arith.constant 1.000000e+00 : f32
    %142 = vector.broadcast %cst_46 : f32 to vector<8x128xf32>
    %143 = arith.addf %142, %141 : vector<8x128xf32>
    %144 = arith.divf %142, %143 : vector<8x128xf32>
    %145 = arith.select %14, %139, %144 : vector<8x128xi1>, vector<8x128xf32>
    %146 = vector.extract_strided_slice %145 {offsets = [0, 0], sizes = [8, 32], strides = [1, 1]} : vector<8x128xf32> to vector<8x32xf32>
    %147 = vector.extract_strided_slice %145 {offsets = [0, 32], sizes = [8, 32], strides = [1, 1]} : vector<8x128xf32> to vector<8x32xf32>
    %148 = vector.extract_strided_slice %145 {offsets = [0, 64], sizes = [8, 32], strides = [1, 1]} : vector<8x128xf32> to vector<8x32xf32>
    %149 = vector.extract_strided_slice %145 {offsets = [0, 96], sizes = [8, 32], strides = [1, 1]} : vector<8x128xf32> to vector<8x32xf32>
    %150 = arith.mulf %147, %129 : vector<8x32xf32>
    %151 = arith.mulf %146, %148 : vector<8x32xf32>
    %152 = arith.addf %150, %151 : vector<8x32xf32>
    %153 = math.tanh %152 : vector<8x32xf32>
    %154 = arith.mulf %149, %153 : vector<8x32xf32>
    %c6_i32 = arith.constant 6 : i32
    %155 = arith.index_cast %c6_i32 : i32 to index
    %c0_47 = arith.constant 0 : index
    %c0_48 = arith.constant 0 : index
    %156 = vector.load %arg8[%155, %c0_47, %c0_48] : memref<8x8x128xf32, #tpu.memory_space<vmem>>, vector<1x8x128xf32>
    %157 = vector.shape_cast %156 : vector<1x8x128xf32> to vector<8x128xf32>
    %158 = arith.truncf %154 : vector<8x32xf32> to vector<8x32xbf16>
    %c0_49 = arith.constant 0 : index
    %c0_50 = arith.constant 0 : index
    %159 = vector.load %arg3[%c0_49, %c0_50] : memref<32x128xbf16, #tpu.memory_space<vmem>>, vector<32x128xbf16>
    %cst_51 = arith.constant dense<0.000000e+00> : vector<8x128xf32>
    %160 = tpu.matmul %158, %159, %cst_51 {dimension_numbers = #tpu.dot_dimension_numbers<[1], [0], [0], [1], [0, 0, 1, 1], [], []>} : vector<8x32xbf16>, vector<32x128xbf16>, vector<8x128xf32> -> vector<8x128xf32>
    %161 = arith.addf %157, %160 : vector<8x128xf32>
    %162 = math.tanh %161 : vector<8x128xf32>
    %163 = arith.negf %161 : vector<8x128xf32>
    %164 = math.exp %163 : vector<8x128xf32>
    %cst_52 = arith.constant 1.000000e+00 : f32
    %165 = vector.broadcast %cst_52 : f32 to vector<8x128xf32>
    %166 = arith.addf %165, %164 : vector<8x128xf32>
    %167 = arith.divf %165, %166 : vector<8x128xf32>
    %168 = arith.select %14, %162, %167 : vector<8x128xi1>, vector<8x128xf32>
    %169 = vector.extract_strided_slice %168 {offsets = [0, 0], sizes = [8, 32], strides = [1, 1]} : vector<8x128xf32> to vector<8x32xf32>
    %170 = vector.extract_strided_slice %168 {offsets = [0, 32], sizes = [8, 32], strides = [1, 1]} : vector<8x128xf32> to vector<8x32xf32>
    %171 = vector.extract_strided_slice %168 {offsets = [0, 64], sizes = [8, 32], strides = [1, 1]} : vector<8x128xf32> to vector<8x32xf32>
    %172 = vector.extract_strided_slice %168 {offsets = [0, 96], sizes = [8, 32], strides = [1, 1]} : vector<8x128xf32> to vector<8x32xf32>
    %173 = arith.mulf %170, %152 : vector<8x32xf32>
    %174 = arith.mulf %169, %171 : vector<8x32xf32>
    %175 = arith.addf %173, %174 : vector<8x32xf32>
    %176 = math.tanh %175 : vector<8x32xf32>
    %177 = arith.mulf %172, %176 : vector<8x32xf32>
    %c7_i32 = arith.constant 7 : i32
    %178 = arith.index_cast %c7_i32 : i32 to index
    %c0_53 = arith.constant 0 : index
    %c0_54 = arith.constant 0 : index
    %179 = vector.load %arg8[%178, %c0_53, %c0_54] : memref<8x8x128xf32, #tpu.memory_space<vmem>>, vector<1x8x128xf32>
    %180 = vector.shape_cast %179 : vector<1x8x128xf32> to vector<8x128xf32>
    %181 = arith.truncf %177 : vector<8x32xf32> to vector<8x32xbf16>
    %c0_55 = arith.constant 0 : index
    %c0_56 = arith.constant 0 : index
    %182 = vector.load %arg3[%c0_55, %c0_56] : memref<32x128xbf16, #tpu.memory_space<vmem>>, vector<32x128xbf16>
    %cst_57 = arith.constant dense<0.000000e+00> : vector<8x128xf32>
    %183 = tpu.matmul %181, %182, %cst_57 {dimension_numbers = #tpu.dot_dimension_numbers<[1], [0], [0], [1], [0, 0, 1, 1], [], []>} : vector<8x32xbf16>, vector<32x128xbf16>, vector<8x128xf32> -> vector<8x128xf32>
    %184 = arith.addf %180, %183 : vector<8x128xf32>
    %185 = math.tanh %184 : vector<8x128xf32>
    %186 = arith.negf %184 : vector<8x128xf32>
    %187 = math.exp %186 : vector<8x128xf32>
    %cst_58 = arith.constant 1.000000e+00 : f32
    %188 = vector.broadcast %cst_58 : f32 to vector<8x128xf32>
    %189 = arith.addf %188, %187 : vector<8x128xf32>
    %190 = arith.divf %188, %189 : vector<8x128xf32>
    %191 = arith.select %14, %185, %190 : vector<8x128xi1>, vector<8x128xf32>
    %192 = vector.extract_strided_slice %191 {offsets = [0, 0], sizes = [8, 32], strides = [1, 1]} : vector<8x128xf32> to vector<8x32xf32>
    %193 = vector.extract_strided_slice %191 {offsets = [0, 32], sizes = [8, 32], strides = [1, 1]} : vector<8x128xf32> to vector<8x32xf32>
    %194 = vector.extract_strided_slice %191 {offsets = [0, 64], sizes = [8, 32], strides = [1, 1]} : vector<8x128xf32> to vector<8x32xf32>
    %195 = vector.extract_strided_slice %191 {offsets = [0, 96], sizes = [8, 32], strides = [1, 1]} : vector<8x128xf32> to vector<8x32xf32>
    %196 = arith.mulf %193, %175 : vector<8x32xf32>
    %197 = arith.mulf %192, %194 : vector<8x32xf32>
    %198 = arith.addf %196, %197 : vector<8x32xf32>
    %199 = math.tanh %198 : vector<8x32xf32>
    %200 = arith.mulf %195, %199 : vector<8x32xf32>
    %c8_i32 = arith.constant 8 : i32
    %201 = arith.truncf %200 : vector<8x32xf32> to vector<8x32xbf16>
    %c0_59 = arith.constant 0 : index
    %c0_60 = arith.constant 0 : index
    %202 = vector.load %arg5[%c0_59, %c0_60] : memref<32x128xbf16, #tpu.memory_space<vmem>>, vector<32x128xbf16>
    %cst_61 = arith.constant dense<0.000000e+00> : vector<8x128xf32>
    %203 = tpu.matmul %201, %202, %cst_61 {dimension_numbers = #tpu.dot_dimension_numbers<[1], [0], [0], [1], [0, 0, 1, 1], [], []>} : vector<8x32xbf16>, vector<32x128xbf16>, vector<8x128xf32> -> vector<8x128xf32>
    %c0_62 = arith.constant 0 : index
    %c0_63 = arith.constant 0 : index
    %204 = vector.load %arg6[%c0_62, %c0_63] : memref<1x128xf32, #tpu.memory_space<vmem>>, vector<1x128xf32>
    %205 = vector.broadcast %204 : vector<1x128xf32> to vector<8x128xf32>
    %206 = arith.addf %203, %205 : vector<8x128xf32>
    %c0_64 = arith.constant 0 : index
    %c0_65 = arith.constant 0 : index
    %207 = vector.load %arg7[%c0_64, %c0_65] : memref<8x128xf32, #tpu.memory_space<vmem>>, vector<8x128xf32>
    tpu.vector_store %arg7[%c0_64, %c0_65], %206 {strides = array<i32>} : memref<8x128xf32, #tpu.memory_space<vmem>>, vector<8x128xf32>,
    return
  }
  func.func @transform_0(%arg0: i32) -> (i32, i32, i32) {
    %c0_i32 = arith.constant 0 : i32
    %c0_i32_0 = arith.constant 0 : i32
    %c0_i32_1 = arith.constant 0 : i32
    return %c0_i32, %arg0, %c0_i32_0 : i32, i32, i32
  }
  func.func @transform_1(%arg0: i32) -> (i32, i32) {
    %c0_i32 = arith.constant 0 : i32
    %c0_i32_0 = arith.constant 0 : i32
    %c0_i32_1 = arith.constant 0 : i32
    return %c0_i32, %c0_i32_0 : i32, i32
  }
  func.func @transform_2(%arg0: i32) -> (i32, i32) {
    %c0_i32 = arith.constant 0 : i32
    %c0_i32_0 = arith.constant 0 : i32
    %c0_i32_1 = arith.constant 0 : i32
    return %c0_i32, %c0_i32_0 : i32, i32
  }
  func.func @transform_3(%arg0: i32) -> (i32, i32) {
    %c0_i32 = arith.constant 0 : i32
    %c0_i32_0 = arith.constant 0 : i32
    %c0_i32_1 = arith.constant 0 : i32
    return %c0_i32, %c0_i32_0 : i32, i32
  }
  func.func @transform_4(%arg0: i32) -> (i32, i32) {
    %c0_i32 = arith.constant 0 : i32
    %c0_i32_0 = arith.constant 0 : i32
    %c0_i32_1 = arith.constant 0 : i32
    return %c0_i32, %c0_i32_0 : i32, i32
  }
  func.func @transform_5(%arg0: i32) -> (i32, i32) {
    %c0_i32 = arith.constant 0 : i32
    %c0_i32_0 = arith.constant 0 : i32
    %c0_i32_1 = arith.constant 0 : i32
    return %c0_i32, %c0_i32_0 : i32, i32
  }
  func.func @transform_6(%arg0: i32) -> (i32, i32) {
    %c0_i32 = arith.constant 0 : i32
    %c0_i32_0 = arith.constant 0 : i32
    return %arg0, %c0_i32 : i32, i32
  }
}

</mosaic_0001>

<bundles_post_ra>
// kernel: tpu_custom_call.1
= control target key start
LH: loop header
LB: loop body
LE: loop exit
PB: predicated region body
PF: predicated region fallthrough
CT: control target
= control target key end

     0   :  { %11 = vsyncpa [#allocation4], 0  ;;  %s1547_s0 = inlined_call_operand.hbm [shape: bf16[8,8,16], index: 0, kind: input, shape index: {}]   ;;  %s1548_s1 = inlined_call_operand.hbm [shape: bf16[16,128], index: 1, kind: input, shape index: {}]   ;;  %s1549_s2 = inlined_call_operand.hbm [shape: bf16[32,128], index: 2, kind: input, shape index: {}]   ;;  %s1550_s3 = inlined_call_operand.vmem [shape: f32[1,128], index: 3, kind: input, shape index: {}]   ;;  %s1551_s4 = inlined_call_operand.hbm [shape: bf16[32,128], index: 4, kind: input, shape index: {}]   ;;  %s1552_s5 = inlined_call_operand.vmem [shape: f32[1,128], index: 5, kind: input, shape index: {}]   ;;  %s1553_s6 = inlined_call_operand.hbm [shape: f32[8,128], index: 6, kind: output, shape index: {}]  }
   0x1   :  { %12 = vsyncpa [#allocation7], 0 }
   0x2   :  { %13 = vsyncpa [#allocation10], 0 }
   0x3   :  { %14 = vsyncpa [#allocation5], 0  ;;  %s1261_s21 = smov [#allocation6]   ;;  %s1262_s23 = smov [#allocation3]  }
   0x4   :  { %s32_s22 = sshll.u32 %s1261_s21, 4  ;;  %s20_s24 = sshll.u32 %s1262_s23, 4  ;;  %s33_s22 = int_to_ptr.vmem [resolvable:$true] %s32_s22  ;;  %s1307_s24 = int_to_ptr.vmem [resolvable:$true] %s20_s24 }
   0x5   :  { %s1143_s27 = scalar_lea.hbm %s1548_s1, 128 }
   0x6   :  { %p1144_p0 = scmp.ne.s32.totalorder %s1548_s1, %s1143_s27  ;;  %p1147_p1 = scmp.lt.u32.totalorder %s1143_s27, %s1548_s1 }
   0x8   :  { %p1149_p2 = pnand %p1147_p1, %p1144_p0 }
   0xa   :  { %1152 = shalt.err (!%p1149_p2)
}
   0xb   :  { %s1153_s8 = scalar_lea.vmem %s33_s22, 128  ;;  %p1158_p4 = scmp.lt.s32.totalorder %s33_s22, %s33_s22 }
   0xc   :  { %p1154_p3 = scmp.ne.s32.totalorder %s33_s22, %s1153_s8  ;;  %p1159_p5 = scmp.lt.s32.totalorder %s1153_s8, %s1153_s8 }
   0xe   :  { %p1160_p6 = por %p1159_p5, %p1158_p4 }
  0x10   :  { %p1161_p7 = pnand %p1160_p6, %p1154_p3 }
  0x12   :  { %1164 = shalt.err (!%p1161_p7)
}
  0x13   :  { %s1263_s9 = smov 64   ;;  %s1264_s10 = smov 4  }
  0x14   :  { %38 = dma.hbm_to_vmem [thread:$0]  %s1548_s1, 128, %s33_s22, [#allocation7], %s1263_s9, %s1263_s9, %s1264_s10  }
  0x15   :  { %s1165_s15 = scalar_lea.hbm %s1547_s0, 512 }
  0x16   :  { %p1166_p8 = scmp.ne.s32.totalorder %s1547_s0, %s1165_s15  ;;  %p1169_p9 = scmp.lt.u32.totalorder %s1165_s15, %s1547_s0 }
  0x18   :  { %p1171_p10 = pnand %p1169_p9, %p1166_p8 }
  0x1a   :  { %1174 = shalt.err (!%p1171_p10)
}
  0x1b   :  { %s1175_s20 = scalar_lea.vmem %s1307_s24, 512  ;;  %p1180_p12 = scmp.lt.s32.totalorder %s1307_s24, %s1307_s24 }
  0x1c   :  { %p1176_p11 = scmp.ne.s32.totalorder %s1307_s24, %s1175_s20  ;;  %p1181_p13 = scmp.lt.s32.totalorder %s1175_s20, %s1175_s20 }
  0x1e   :  { %p1182_p0 = por %p1181_p13, %p1180_p12 }
  0x20   :  { %p1183_p1 = pnand %p1182_p0, %p1176_p11 }
  0x22   :  { %1186 = shalt.err (!%p1183_p1)
}
  0x23   :  { %26 = dma.hbm_to_vmem [thread:$0]  %s1547_s0, 512, %s1307_s24, [#allocation4], %s1263_s9, %s1263_s9, %s1264_s10  }
  0x24   :  { %s1265_s22 = smov [#allocation8]   ;;  %s1266_s25 = smov [#allocation9]  }
  0x25   :  { %s44_s23 = sshll.u32 %s1265_s22, 4  ;;  %s58_s26 = sshll.u32 %s1266_s25, 4  ;;  %s45_s23 = int_to_ptr.vmem [resolvable:$true] %s44_s23  ;;  %s1344_s26 = int_to_ptr.vmem [resolvable:$true] %s58_s26 }
  0x26   :  { %s1187_s29 = scalar_lea.hbm %s1549_s2, 256 }
  0x27   :  { %p1188_p2 = scmp.ne.s32.totalorder %s1549_s2, %s1187_s29  ;;  %p1191_p3 = scmp.lt.u32.totalorder %s1187_s29, %s1549_s2 }
  0x29   :  { %p1193_p4 = pnand %p1191_p3, %p1188_p2 }
  0x2b   :  { %1196 = shalt.err (!%p1193_p4)
}
  0x2c   :  { %s1197_s0 = scalar_lea.vmem %s45_s23, 256  ;;  %p1202_p6 = scmp.lt.s32.totalorder %s45_s23, %s45_s23 }
  0x2d   :  { %p1198_p5 = scmp.ne.s32.totalorder %s45_s23, %s1197_s0  ;;  %p1203_p7 = scmp.lt.s32.totalorder %s1197_s0, %s1197_s0 }
  0x2f   :  { %p1204_p8 = por %p1203_p7, %p1202_p6 }
  0x31   :  { %p1205_p9 = pnand %p1204_p8, %p1198_p5 }
  0x33   :  { %1208 = shalt.err (!%p1205_p9)
}
  0x34   :  { %50 = dma.hbm_to_vmem [thread:$0]  %s1549_s2, 256, %s45_s23, [#allocation7], %s1263_s9, %s1263_s9, %s1264_s10  }
  0x35   :  { %s1209_s15 = scalar_lea.hbm %s1551_s4, 256 }
  0x36   :  { %p1210_p10 = scmp.ne.s32.totalorder %s1551_s4, %s1209_s15  ;;  %p1213_p11 = scmp.lt.u32.totalorder %s1209_s15, %s1551_s4 }
  0x38   :  { %p1215_p12 = pnand %p1213_p11, %p1210_p10 }
  0x3a   :  { %1218 = shalt.err (!%p1215_p12)
}
  0x3b   :  { %s1219_s20 = scalar_lea.vmem %s1344_s26, 256  ;;  %p1224_p0 = scmp.lt.s32.totalorder %s1344_s26, %s1344_s26 }
  0x3c   :  { %p1220_p13 = scmp.ne.s32.totalorder %s1344_s26, %s1219_s20  ;;  %p1225_p1 = scmp.lt.s32.totalorder %s1219_s20, %s1219_s20 }
  0x3e   :  { %p1226_p2 = por %p1225_p1, %p1224_p0 }
  0x40   :  { %p1227_p3 = pnand %p1226_p2, %p1220_p13 }
  0x42   :  { %1230 = shalt.err (!%p1227_p3)
}
  0x43   :  { %64 = dma.hbm_to_vmem [thread:$0]  %s1551_s4, 256, %s1344_s26, [#allocation10], %s1263_s9, %s1263_s9, %s1264_s10  }
  0x44   :  { %1253 = dma.done.wait [#allocation4], 512  }
  0x45   :  { %1254 = vsyncadd [#allocation4], 4294966784 }
  0x46   :  { %1255 = dma.done.wait [#allocation7], 384  }
  0x47   :  { %1256 = vsyncadd [#allocation7], 4294966912 }
  0x48   :  { %1257 = dma.done.wait [#allocation10], 256  }
  0x49   :  { %1258 = vsyncadd [#allocation10], 4294967040  ;;  %v1267_v0 = vmov 0.0   ;;  %vm1268_vm0 = vmmov 0   ;;  %v1070_v1 = vld [vmem:[#allocation6] sm:$0xff]   ;;  %v1384_v2 = vld [vmem:[#allocation8] sm:$0xff]   ;;  %v209_v20 = vlaneseq }
  0x4a   :  { %987 = vmatprep.subr.bf16.mxu1 %v1267_v0  ;;  %991 = vmatprep.mubr.msk.bf16.mxu1 %vm1268_vm0, %v1267_v0  ;;  %vm123_vm1 = vcmask 130048   ;;  %v1072_v3 = vld [vmem:[#allocation3] sm:$0xff]   ;;  %v1073_v4 = vld [vmem:[#allocation3 + $0x8] sm:$0xff]   ;;  %v1389_v5 = vld [vmem:[#allocation8 + $0x8] sm:$0xff]   ;;  %v1269_v6 = vmov 0   ;;  %vm231_vm5 = vcmask 261120  }
  0x4b   :  { %977 = vmatprep.subr.bf16.mxu0 %v1070_v1  ;;  %988 = vmatpush3.bf16.msra.mxu1 %v1384_v2  ;;  %v1408_v7 = vld [vmem:[%s1550_s3] ss:$0 sm:$0xff]  ;;  %v210_v22 = vand.u32 127, %v209_v20  ;;  %s1270_s3 = smov 32   ;;  %v1075_v54 = vld [vmem:[#allocation3 + $0x10] sm:$0xff]   ;;  %v1076_v55 = vld [vmem:[#allocation3 + $0x18] sm:$0xff]  }
  0x4c   :  { %978 = vmatpush3.bf16.msra.mxu0 %v1070_v1  ;;  %979 = vmatprep.mubr.msk.bf16.mxu0 %vm123_vm1, %v1072_v3  ;;  %s1271_s23 = smov [#allocation11]  }
  0x4d   :  { %989 = vmatprep.subr.bf16.mxu1 %v1267_v0  ;;  %1003 = vmatprep.subr.bf16.mxu0 %v1267_v0  ;;  %vm211_vm2 = vcmp.ge.s32.totalorder %v210_v22, 64  ;;  %vm212_vm3 = vcmp.lt.s32.totalorder %v210_v22, 96  ;;  %s903_s25 = sshll.u32 %s1271_s23, 4  ;;  %s904_s25 = int_to_ptr.vmem [resolvable:$true] %s903_s25 }
  0x4e   :  { %vm1415_vm4 = vmand %vm211_vm2, %vm212_vm3  ;;  %p1236_p5 = scmp.lt.s32.totalorder %s904_s25, %s904_s25 }
  0x4f   :  { %980 = vmatmul.mubr.msk.bf16.vlgmr.msra.gmra.mrb[0].mxu0 %vm123_vm1, %v1073_v4  ;;  %990 = vmatpush3.bf16.msra.mxu1 %v1389_v5 }
  0x50   :  { %1004 = vmatpush3.bf16.msra.mxu0 %v1384_v2  ;;  %995 = vmatprep.subr.bf16.mxu1 %v1267_v0 }
  0x51   :  { %1005 = vmatprep.subr.bf16.mxu0 %v1267_v0  ;;  %983 = vmatprep.mubr.msk.bf16.mxu0 %vm123_vm1, %v1075_v54 }
  0x52   :  { %992 = vmatmul.mubr.bf16.vlgmr.msra.gmra.mrb[0].mxu1 %v1269_v6 }
  0x53   :  { %996 = vmatpush3.bf16.msra.mxu1 %v1384_v2  ;;  %999 = vmatprep.mubr.msk.bf16.mxu1 %vm1268_vm0, %v1267_v0 }
  0x54   :  { %997 = vmatprep.subr.bf16.mxu1 %v1267_v0  ;;  %1006 = vmatpush3.bf16.msra.mxu0 %v1389_v5 }
  0x55   :  { %1019 = vmatprep.subr.bf16.mxu0 %v1267_v0 }
  0x57   :  { %998 = vmatpush3.bf16.msra.mxu1 %v1389_v5  ;;  %984 = vmatmul.mubr.msk.bf16.gmra.mrb[4].mxu0 %vm123_vm1, %v1076_v55 }
  0x58   :  { %1011 = vmatprep.subr.bf16.mxu1 %v1267_v0  ;;  %1007 = vmatprep.mubr.msk.bf16.mxu0 %vm1268_vm0, %v1267_v0 }
 0x122   :  { %v1410_v8 = vpop.f32.mrb[0].mxu0 }
 0x123   :  { %v170_v9 = vpop.f32.mrb[1].mxu0  ;;  %v179_v3 = vadd.f32 %v1410_v8, %v1408_v7 }
 0x124   :  { %v171_v10 = vadd.f32 %v1408_v7, %v170_v9  ;;  %v1413_v11 = vpop.f32.mrb[2].mxu0 }
 0x125   :  { %v173_v12 = vpop.f32.mrb[3].mxu0  ;;  %v269_v13 = vpop.f32.mrb[0].mxu1 }
 0x126   :  { %v275_v14 = vadd.f32 %v269_v13, %v171_v10  ;;  %v993_v15 = vpop.f32.mrb[1].mxu1  ;;  %v174_v37 = vadd.f32 %v1408_v7, %v173_v12 }
 0x127   :  { %v272_v16 = vpop.f32.mrb[2].mxu1 }
 0x128   :  { %v926_v17 = vmul.f32 -1.442695, %v275_v14  ;;  %v994_v18 = vpop.f32.mrb[3].mxu1 }
 0x12a   :  { %1079 = vpow2.f32 %v926_v17  ;;  %v1443_v60 = vpop.f32.mrb[4].mxu0 }
 0x12b   :  { %1081 = vtanh.f32 %v275_v14  ;;  %v1445_v61 = vpop.f32.mrb[5].mxu0 }
 0x12c   :  { %v1447_v62 = vpop.f32.mrb[6].mxu0 }
 0x12d   :  { %v1449_v63 = vpop.f32.mrb[7].mxu0 }
 0x134   :  { %v1080_v19 = vpop.eup %1079 }
 0x135   :  { %v280_v21 = vadd.f32 1.0, %v1080_v19  ;;  %v1082_v24 = vpop.eup %1081 }
 0x137   :  { %1083 = vrcp.f32 %v280_v21 }
 0x141   :  { %v1084_v25 = vpop.eup %1083 }
 0x142   :  { %v283_v26 = vsel %vm1415_vm4, %v1082_v24, %v1084_v25 }
 0x143   :  { %286 = vrot.lane.b32.xlu0 %v283_v26, %s1263_s9  ;;  %v284_v29 = vmul.f32 0.0, %v283_v26 }
 0x1b5   :  { %v287_v27 = vpop.permute.xlu0 %286 }
 0x1b6   :  { %v289_v28 = vmul.f32 %v287_v27, %v283_v26 }
 0x1b8   :  { %291 = vrot.lane.b32.xlu0 %v289_v28, %s1270_s3 }
 0x22a   :  { %v292_v30 = vpop.permute.xlu0 %291 }
 0x22b   :  { %v294_v31 = vadd.f32 %v292_v30, %v284_v29  ;;  %v182_v29 = vadd.f32 %v1413_v11, %v1408_v7 }
 0x22d   :  { %1085 = vtanh.f32 %v294_v31 }
 0x237   :  { %v1086_v32 = vpop.eup %1085 }
 0x238   :  { %297 = vrot.lane.b32.xlu1 %v1086_v32, %s1263_s9 }
 0x2aa   :  { %v298_v33 = vpop.permute.xlu1 %297 }
 0x2ab   :  { %v300_v34 = vmul.f32 %v298_v33, %v283_v26 }
 0x2ad   :  { %v303_v35 = vpack.c.bf16 %v300_v34, %v300_v34 }
 0x2af   :  { %305 = vrot.lane.b32.xlu1 %v303_v35, %s1270_s3 }
 0x321   :  { %v306_v36 = vpop.permute.xlu1 %305 }
 0x322   :  { %1000 = vmatmul.mubr.msk.bf16.vlgmr.msra.gmra.mrb[4].mxu1 %vm231_vm5, %v306_v36 }
 0x323   :  { %1012 = vmatpush3.bf16.msra.mxu1 %v1384_v2  ;;  %1015 = vmatprep.mubr.msk.bf16.mxu1 %vm1268_vm0, %v1267_v0 }
 0x324   :  { %1013 = vmatprep.subr.bf16.mxu1 %v1267_v0 }
 0x327   :  { %1014 = vmatpush3.bf16.msra.mxu1 %v1389_v5 }
 0x328   :  { %1027 = vmatprep.subr.bf16.mxu1 %v1267_v0 }
 0x3f5   :  { %v344_v38 = vpop.f32.mrb[4].mxu1 }
 0x3f6   :  { %v350_v39 = vadd.f32 %v344_v38, %v174_v37  ;;  %v1001_v40 = vpop.f32.mrb[5].mxu1 }
 0x3f7   :  { %v347_v41 = vpop.f32.mrb[6].mxu1 }
 0x3f8   :  { %v928_v42 = vmul.f32 -1.442695, %v350_v39  ;;  %v1002_v43 = vpop.f32.mrb[7].mxu1 }
 0x3fa   :  { %1087 = vpow2.f32 %v928_v42 }
 0x3fb   :  { %1089 = vtanh.f32 %v350_v39 }
 0x404   :  { %v1088_v44 = vpop.eup %1087 }
 0x405   :  { %v355_v45 = vadd.f32 1.0, %v1088_v44  ;;  %v1090_v46 = vpop.eup %1089 }
 0x407   :  { %1091 = vrcp.f32 %v355_v45 }
 0x411   :  { %v1092_v47 = vpop.eup %1091 }
 0x412   :  { %v358_v48 = vsel %vm1415_vm4, %v1090_v46, %v1092_v47 }
 0x413   :  { %361 = vrot.lane.b32.xlu0 %v358_v48, %s1263_s9  ;;  %v359_v51 = vmul.f32 %v358_v48, %v294_v31 }
 0x485   :  { %v362_v49 = vpop.permute.xlu0 %361 }
 0x486   :  { %v364_v50 = vmul.f32 %v362_v49, %v358_v48 }
 0x488   :  { %366 = vrot.lane.b32.xlu1 %v364_v50, %s1270_s3  ;;  %v187_v50 = vadd.f32 %v1408_v7, %v1445_v61 }
 0x4fa   :  { %v367_v52 = vpop.permute.xlu1 %366 }
 0x4fb   :  { %v369_v53 = vadd.f32 %v367_v52, %v359_v51 }
 0x4fd   :  { %1093 = vtanh.f32 %v369_v53 }
 0x507   :  { %v1094_v56 = vpop.eup %1093 }
 0x508   :  { %372 = vrot.lane.b32.xlu0 %v1094_v56, %s1263_s9 }
 0x57a   :  { %v373_v57 = vpop.permute.xlu0 %372 }
 0x57b   :  { %v375_v58 = vmul.f32 %v373_v57, %v358_v48 }
 0x57d   :  { %v378_v59 = vpack.c.bf16 %v375_v58, %v375_v58 }
 0x57f   :  { %380 = vrot.lane.b32.xlu1 %v378_v59, %s1270_s3 }
 0x5f1   :  { %v381_v1 = vpop.permute.xlu1 %380 }
 0x5f2   :  { %1008 = vmatmul.mubr.msk.bf16.vlgmr.msra.gmra.mrb[8].mxu0 %vm231_vm5, %v381_v1 }
 0x5f3   :  { %1020 = vmatpush3.bf16.msra.mxu0 %v1384_v2  ;;  %1023 = vmatprep.mubr.msk.bf16.mxu0 %vm1268_vm0, %v1267_v0 }
 0x5f4   :  { %1021 = vmatprep.subr.bf16.mxu0 %v1267_v0 }
 0x5f7   :  { %1022 = vmatpush3.bf16.msra.mxu0 %v1389_v5 }
 0x5f8   :  { %1035 = vmatprep.subr.bf16.mxu0 %v1267_v0 }
 0x6c5   :  { %v419_v4 = vpop.f32.mrb[8].mxu0 }
 0x6c6   :  { %v425_v6 = vadd.f32 %v419_v4, %v179_v3  ;;  %v1009_v9 = vpop.f32.mrb[9].mxu0 }
 0x6c7   :  { %v422_v10 = vpop.f32.mrb[10].mxu0 }
 0x6c8   :  { %v930_v12 = vmul.f32 -1.442695, %v425_v6  ;;  %v1010_v13 = vpop.f32.mrb[11].mxu0 }
 0x6ca   :  { %1095 = vpow2.f32 %v930_v12 }
 0x6cb   :  { %1097 = vtanh.f32 %v425_v6 }
 0x6d4   :  { %v1096_v14 = vpop.eup %1095 }
 0x6d5   :  { %v430_v15 = vadd.f32 1.0, %v1096_v14  ;;  %v1098_v16 = vpop.eup %1097 }
 0x6d7   :  { %1099 = vrcp.f32 %v430_v15 }
 0x6e1   :  { %v1100_v17 = vpop.eup %1099 }
 0x6e2   :  { %v433_v18 = vsel %vm1415_vm4, %v1098_v16, %v1100_v17  ;;  %v190_v17 = vadd.f32 %v1408_v7, %v1449_v63 }
 0x6e3   :  { %436 = vrot.lane.b32.xlu0 %v433_v18, %s1263_s9  ;;  %v434_v20 = vmul.f32 %v433_v18, %v369_v53 }
 0x755   :  { %v437_v19 = vpop.permute.xlu0 %436 }
 0x756   :  { %v439_v8 = vmul.f32 %v437_v19, %v433_v18 }
 0x758   :  { %441 = vrot.lane.b32.xlu1 %v439_v8, %s1270_s3 }
 0x7ca   :  { %v442_v21 = vpop.permute.xlu1 %441 }
 0x7cb   :  { %v444_v22 = vadd.f32 %v442_v21, %v434_v20 }
 0x7cd   :  { %1101 = vtanh.f32 %v444_v22 }
 0x7d7   :  { %v1102_v24 = vpop.eup %1101 }
 0x7d8   :  { %447 = vrot.lane.b32.xlu0 %v1102_v24, %s1263_s9 }
 0x84a   :  { %v448_v25 = vpop.permute.xlu0 %447 }
 0x84b   :  { %v450_v26 = vmul.f32 %v448_v25, %v433_v18 }
 0x84d   :  { %v453_v27 = vpack.c.bf16 %v450_v26, %v450_v26 }
 0x84f   :  { %455 = vrot.lane.b32.xlu1 %v453_v27, %s1270_s3 }
 0x8c1   :  { %v456_v28 = vpop.permute.xlu1 %455 }
 0x8c2   :  { %1016 = vmatmul.mubr.msk.bf16.vlgmr.msra.gmra.mrb[8].mxu1 %vm231_vm5, %v456_v28 }
 0x8c3   :  { %1028 = vmatpush3.bf16.msra.mxu1 %v1384_v2  ;;  %1031 = vmatprep.mubr.msk.bf16.mxu1 %vm1268_vm0, %v1267_v0 }
 0x8c4   :  { %1029 = vmatprep.subr.bf16.mxu1 %v1267_v0 }
 0x8c7   :  { %1030 = vmatpush3.bf16.msra.mxu1 %v1389_v5 }
 0x8c8   :  { %1043 = vmatprep.subr.bf16.mxu1 %v1267_v0 }
 0x995   :  { %v494_v30 = vpop.f32.mrb[8].mxu1 }
 0x996   :  { %v500_v31 = vadd.f32 %v494_v30, %v182_v29  ;;  %v1017_v32 = vpop.f32.mrb[9].mxu1 }
 0x997   :  { %v497_v33 = vpop.f32.mrb[10].mxu1 }
 0x998   :  { %v932_v34 = vmul.f32 -1.442695, %v500_v31  ;;  %v1018_v35 = vpop.f32.mrb[11].mxu1 }
 0x99a   :  { %1103 = vpow2.f32 %v932_v34 }
 0x99b   :  { %1105 = vtanh.f32 %v500_v31 }
 0x9a4   :  { %v1104_v36 = vpop.eup %1103 }
 0x9a5   :  { %v505_v37 = vadd.f32 1.0, %v1104_v36  ;;  %v1106_v38 = vpop.eup %1105  ;;  %v195_v36 = vadd.f32 %v1443_v60, %v1408_v7 }
 0x9a7   :  { %1107 = vrcp.f32 %v505_v37 }
 0x9b1   :  { %v1108_v39 = vpop.eup %1107 }
 0x9b2   :  { %v508_v40 = vsel %vm1415_vm4, %v1106_v38, %v1108_v39 }
 0x9b3   :  { %511 = vrot.lane.b32.xlu0 %v508_v40, %s1263_s9  ;;  %v509_v42 = vmul.f32 %v508_v40, %v444_v22 }
 0xa25   :  { %v512_v41 = vpop.permute.xlu0 %511 }
 0xa26   :  { %v514_v11 = vmul.f32 %v512_v41, %v508_v40 }
 0xa28   :  { %516 = vrot.lane.b32.xlu1 %v514_v11, %s1270_s3 }
 0xa9a   :  { %v517_v43 = vpop.permute.xlu1 %516 }
 0xa9b   :  { %v519_v44 = vadd.f32 %v517_v43, %v509_v42 }
 0xa9d   :  { %1109 = vtanh.f32 %v519_v44 }
 0xaa7   :  { %v1110_v45 = vpop.eup %1109 }
 0xaa8   :  { %522 = vrot.lane.b32.xlu0 %v1110_v45, %s1263_s9 }
 0xb1a   :  { %v523_v46 = vpop.permute.xlu0 %522 }
 0xb1b   :  { %v525_v47 = vmul.f32 %v523_v46, %v508_v40 }
 0xb1d   :  { %v528_v48 = vpack.c.bf16 %v525_v47, %v525_v47 }
 0xb1f   :  { %530 = vrot.lane.b32.xlu1 %v528_v48, %s1270_s3 }
 0xb91   :  { %v531_v49 = vpop.permute.xlu1 %530 }
 0xb92   :  { %1024 = vmatmul.mubr.msk.bf16.vlgmr.msra.gmra.mrb[12].mxu0 %vm231_vm5, %v531_v49 }
 0xb93   :  { %1036 = vmatpush3.bf16.msra.mxu0 %v1384_v2  ;;  %1039 = vmatprep.mubr.msk.bf16.mxu0 %vm1268_vm0, %v1267_v0 }
 0xb94   :  { %1037 = vmatprep.subr.bf16.mxu0 %v1267_v0 }
 0xb97   :  { %1038 = vmatpush3.bf16.msra.mxu0 %v1389_v5 }
 0xb98   :  { %1051 = vmatprep.subr.bf16.mxu0 %v1267_v0 }
 0xc65   :  { %v569_v51 = vpop.f32.mrb[12].mxu0 }
 0xc66   :  { %v575_v52 = vadd.f32 %v569_v51, %v187_v50  ;;  %v1025_v53 = vpop.f32.mrb[13].mxu0 }
 0xc67   :  { %v572_v54 = vpop.f32.mrb[14].mxu0 }
 0xc68   :  { %v934_v55 = vmul.f32 -1.442695, %v575_v52  ;;  %v1026_v56 = vpop.f32.mrb[15].mxu0 }
 0xc69   :  { %v198_v56 = vadd.f32 %v1447_v62, %v1408_v7 }
 0xc6a   :  { %1111 = vpow2.f32 %v934_v55 }
 0xc6b   :  { %1113 = vtanh.f32 %v575_v52 }
 0xc74   :  { %v1112_v57 = vpop.eup %1111 }
 0xc75   :  { %v580_v58 = vadd.f32 1.0, %v1112_v57  ;;  %v1114_v59 = vpop.eup %1113 }
 0xc77   :  { %1115 = vrcp.f32 %v580_v58 }
 0xc81   :  { %v1116_v1 = vpop.eup %1115 }
 0xc82   :  { %v583_v3 = vsel %vm1415_vm4, %v1114_v59, %v1116_v1 }
 0xc83   :  { %586 = vrot.lane.b32.xlu0 %v583_v3, %s1263_s9  ;;  %v584_v6 = vmul.f32 %v583_v3, %v519_v44 }
 0xcf5   :  { %v587_v4 = vpop.permute.xlu0 %586 }
 0xcf6   :  { %v589_v61 = vmul.f32 %v587_v4, %v583_v3 }
 0xcf8   :  { %591 = vrot.lane.b32.xlu1 %v589_v61, %s1270_s3 }
 0xd6a   :  { %v592_v9 = vpop.permute.xlu1 %591 }
 0xd6b   :  { %v594_v10 = vadd.f32 %v592_v9, %v584_v6 }
 0xd6d   :  { %1117 = vtanh.f32 %v594_v10 }
 0xd77   :  { %v1118_v12 = vpop.eup %1117 }
 0xd78   :  { %597 = vrot.lane.b32.xlu0 %v1118_v12, %s1263_s9 }
 0xdea   :  { %v598_v13 = vpop.permute.xlu0 %597 }
 0xdeb   :  { %v600_v14 = vmul.f32 %v598_v13, %v583_v3 }
 0xded   :  { %v603_v15 = vpack.c.bf16 %v600_v14, %v600_v14 }
 0xdef   :  { %605 = vrot.lane.b32.xlu1 %v603_v15, %s1270_s3 }
 0xe61   :  { %v606_v16 = vpop.permute.xlu1 %605 }
 0xe62   :  { %1032 = vmatmul.mubr.msk.bf16.vlgmr.msra.gmra.mrb[12].mxu1 %vm231_vm5, %v606_v16  ;;  %v1077_v16 = vld [vmem:[#allocation9] sm:$0xff]  }
 0xe63   :  { %1044 = vmatpush3.bf16.msra.mxu1 %v1384_v2  ;;  %1047 = vmatprep.mubr.msk.bf16.mxu1 %vm1268_vm0, %v1267_v0 }
 0xe64   :  { %1045 = vmatprep.subr.bf16.mxu1 %v1267_v0 }
 0xe67   :  { %1046 = vmatpush3.bf16.msra.mxu1 %v1389_v5 }
 0xf35   :  { %v644_v18 = vpop.f32.mrb[12].mxu1 }
 0xf36   :  { %v650_v19 = vadd.f32 %v644_v18, %v190_v17  ;;  %v1033_v8 = vpop.f32.mrb[13].mxu1  ;;  %v1078_v17 = vld [vmem:[#allocation9 + $0x8] sm:$0xff]  }
 0xf37   :  { %v647_v20 = vpop.f32.mrb[14].mxu1 }
 0xf38   :  { %v936_v21 = vmul.f32 -1.442695, %v650_v19  ;;  %v1034_v22 = vpop.f32.mrb[15].mxu1 }
 0xf3a   :  { %1119 = vpow2.f32 %v936_v21  ;;  %v941_v21 = vld [vmem:[%s1552_s5] ss:$0 sm:$0xff] }
 0xf3b   :  { %1121 = vtanh.f32 %v650_v19 }
 0xf44   :  { %v1120_v24 = vpop.eup %1119 }
 0xf45   :  { %v655_v25 = vadd.f32 1.0, %v1120_v24  ;;  %v1122_v2 = vpop.eup %1121 }
 0xf47   :  { %1123 = vrcp.f32 %v655_v25 }
 0xf51   :  { %v1124_v26 = vpop.eup %1123 }
 0xf52   :  { %v658_v27 = vsel %vm1415_vm4, %v1122_v2, %v1124_v26 }
 0xf53   :  { %661 = vrot.lane.b32.xlu0 %v658_v27, %s1263_s9  ;;  %v659_v28 = vmul.f32 %v658_v27, %v594_v10 }
 0xfc5   :  { %v662_v5 = vpop.permute.xlu0 %661 }
 0xfc6   :  { %v664_v63 = vmul.f32 %v662_v5, %v658_v27 }
 0xfc8   :  { %666 = vrot.lane.b32.xlu1 %v664_v63, %s1270_s3 }
0x103a   :  { %v667_v29 = vpop.permute.xlu1 %666 }
0x103b   :  { %v669_v30 = vadd.f32 %v667_v29, %v659_v28 }
0x103d   :  { %1125 = vtanh.f32 %v669_v30 }
0x1047   :  { %v1126_v31 = vpop.eup %1125 }
0x1048   :  { %672 = vrot.lane.b32.xlu0 %v1126_v31, %s1263_s9 }
0x10ba   :  { %v673_v32 = vpop.permute.xlu0 %672 }
0x10bb   :  { %v675_v33 = vmul.f32 %v673_v32, %v658_v27 }
0x10bd   :  { %v678_v34 = vpack.c.bf16 %v675_v33, %v675_v33 }
0x10bf   :  { %680 = vrot.lane.b32.xlu1 %v678_v34, %s1270_s3 }
0x1131   :  { %v681_v35 = vpop.permute.xlu1 %680 }
0x1132   :  { %1040 = vmatmul.mubr.msk.bf16.vlgmr.msra.gmra.mrb[16].mxu0 %vm231_vm5, %v681_v35 }
0x1133   :  { %1055 = vmatprep.mubr.msk.bf16.mxu0 %vm1268_vm0, %v1267_v0  ;;  %1052 = vmatpush3.bf16.msra.mxu0 %v1077_v16 }
0x1134   :  { %1053 = vmatprep.subr.bf16.mxu0 %v1267_v0 }
0x1137   :  { %1054 = vmatpush3.bf16.msra.mxu0 %v1078_v17 }
0x1205   :  { %v719_v37 = vpop.f32.mrb[16].mxu0 }
0x1206   :  { %v725_v38 = vadd.f32 %v719_v37, %v195_v36  ;;  %v1041_v39 = vpop.f32.mrb[17].mxu0 }
0x1207   :  { %v722_v40 = vpop.f32.mrb[18].mxu0 }
0x1208   :  { %v938_v41 = vmul.f32 -1.442695, %v725_v38  ;;  %v1042_v11 = vpop.f32.mrb[19].mxu0 }
0x120a   :  { %1127 = vpow2.f32 %v938_v41 }
0x120b   :  { %1129 = vtanh.f32 %v725_v38 }
0x1214   :  { %v1128_v42 = vpop.eup %1127 }
0x1215   :  { %v730_v43 = vadd.f32 1.0, %v1128_v42  ;;  %v1130_v44 = vpop.eup %1129 }
0x1217   :  { %1131 = vrcp.f32 %v730_v43 }
0x1221   :  { %v1132_v45 = vpop.eup %1131 }
0x1222   :  { %v733_v46 = vsel %vm1415_vm4, %v1130_v44, %v1132_v45 }
0x1223   :  { %736 = vrot.lane.b32.xlu0 %v733_v46, %s1263_s9  ;;  %v734_v48 = vmul.f32 %v733_v46, %v669_v30 }
0x1295   :  { %v737_v47 = vpop.permute.xlu0 %736 }
0x1296   :  { %v739_v60 = vmul.f32 %v737_v47, %v733_v46 }
0x1298   :  { %741 = vrot.lane.b32.xlu1 %v739_v60, %s1270_s3 }
0x130a   :  { %v742_v49 = vpop.permute.xlu1 %741 }
0x130b   :  { %v744_v50 = vadd.f32 %v742_v49, %v734_v48 }
0x130d   :  { %1133 = vtanh.f32 %v744_v50 }
0x1317   :  { %v1134_v51 = vpop.eup %1133 }
0x1318   :  { %747 = vrot.lane.b32.xlu0 %v1134_v51, %s1263_s9 }
0x138a   :  { %v748_v52 = vpop.permute.xlu0 %747 }
0x138b   :  { %v750_v53 = vmul.f32 %v748_v52, %v733_v46 }
0x138d   :  { %v753_v54 = vpack.c.bf16 %v750_v53, %v750_v53 }
0x138f   :  { %755 = vrot.lane.b32.xlu1 %v753_v54, %s1270_s3 }
0x1401   :  { %v756_v55 = vpop.permute.xlu1 %755 }
0x1402   :  { %1048 = vmatmul.mubr.msk.bf16.vlgmr.msra.gmra.mrb[16].mxu1 %vm231_vm5, %v756_v55 }
0x14d5   :  { %v794_v57 = vpop.f32.mrb[16].mxu1 }
0x14d6   :  { %v800_v58 = vadd.f32 %v794_v57, %v198_v56  ;;  %v1049_v59 = vpop.f32.mrb[17].mxu1 }
0x14d7   :  { %v797_v1 = vpop.f32.mrb[18].mxu1 }
0x14d8   :  { %v940_v3 = vmul.f32 -1.442695, %v800_v58  ;;  %v1050_v4 = vpop.f32.mrb[19].mxu1 }
0x14da   :  { %1135 = vpow2.f32 %v940_v3 }
0x14db   :  { %1137 = vtanh.f32 %v800_v58 }
0x14e4   :  { %v1136_v61 = vpop.eup %1135 }
0x14e5   :  { %v805_v6 = vadd.f32 1.0, %v1136_v61  ;;  %v1138_v9 = vpop.eup %1137 }
0x14e7   :  { %1139 = vrcp.f32 %v805_v6 }
0x14f1   :  { %v1140_v10 = vpop.eup %1139 }
0x14f2   :  { %v808_v12 = vsel %vm1415_vm4, %v1138_v9, %v1140_v10 }
0x14f3   :  { %811 = vrot.lane.b32.xlu0 %v808_v12, %s1263_s9  ;;  %v809_v62 = vmul.f32 %v808_v12, %v744_v50 }
0x1565   :  { %v812_v13 = vpop.permute.xlu0 %811 }
0x1566   :  { %v814_v7 = vmul.f32 %v812_v13, %v808_v12 }
0x1568   :  { %816 = vrot.lane.b32.xlu1 %v814_v7, %s1270_s3 }
0x15da   :  { %v817_v14 = vpop.permute.xlu1 %816 }
0x15db   :  { %v819_v15 = vadd.f32 %v817_v14, %v809_v62 }
0x15dd   :  { %1141 = vtanh.f32 %v819_v15 }
0x15e7   :  { %v1142_v18 = vpop.eup %1141 }
0x15e8   :  { %822 = vrot.lane.b32.xlu0 %v1142_v18, %s1263_s9  ;;  %s1231_s9 = scalar_lea.vmem %s904_s25, 128 }
0x15e9   :  { %p1232_p4 = scmp.ne.s32.totalorder %s904_s25, %s1231_s9  ;;  %p1237_p6 = scmp.lt.s32.totalorder %s1231_s9, %s1231_s9 }
0x15eb   :  { %p1238_p7 = por %p1237_p6, %p1236_p5 }
0x15ed   :  { %p1239_p8 = pnand %p1238_p7, %p1232_p4 }
0x165a   :  { %v823_v23 = vpop.permute.xlu0 %822 }
0x165b   :  { %v825_v19 = vmul.f32 %v823_v23, %v808_v12 }
0x165d   :  { %v826_v8 = vpack.c.bf16 %v825_v19, %v825_v19 }
0x165f   :  { %839 = vrot.lane.b32.xlu1 %v826_v8, %s1270_s3 }
0x16d1   :  { %v840_v20 = vpop.permute.xlu1 %839 }
0x16d2   :  { %1056 = vmatmul.mubr.msk.bf16.vlgmr.msra.gmra.mrb[20].mxu0 %vm231_vm5, %v840_v20 }
0x17a5   :  { %v890_v22 = vpop.f32.mrb[20].mxu0 }
0x17a6   :  { %v891_v0 = vadd.f32 %v941_v21, %v890_v22  ;;  %v1057_v24 = vpop.f32.mrb[21].mxu0 }
0x17a7   :  { %v893_v25 = vpop.f32.mrb[22].mxu0 }
0x17a8   :  { %896 = vst [vmem:[#allocation11] sm:$0xff] %v891_v0  ;;  %v1058_v2 = vpop.f32.mrb[23].mxu0 }
0x17a9   :  { %1242 = shalt.err (!%p1239_p8)
}
0x17aa   :  { %s1243_s5 = scalar_lea.hbm %s1553_s6, 128 }
0x17ab   :  { %p1244_p9 = scmp.ne.s32.totalorder %s1553_s6, %s1243_s5  ;;  %p1247_p10 = scmp.lt.u32.totalorder %s1243_s5, %s1553_s6 }
0x17ad   :  { %p1249_p11 = pnand %p1247_p10, %p1244_p9 }
0x17af   :  { %1252 = shalt.err (!%p1249_p11)
}
0x17b0   :  { %906 = dma.vmem_to_hbm [thread:$0]  %s904_s25, 128, %s1553_s6, [#allocation5]  }
0x17b1   :  { %1259 = dma.done.wait [#allocation5], 128  }
0x17b2   :  { %1260 = vsyncadd [#allocation5], 4294967168 }
0x17b3   :  { %910 = vsyncpa [#allocation4], 1 }
0x17b4   :  { %911 = vsyncpa [#allocation7], 1 }
0x17b5   :  { %912 = vsyncpa [#allocation10], 1 }
0x17b6   :  { %913 = vsyncpa [#allocation5], 1 }

</bundles_post_ra>
